<compile_context>
chip_gen: v5e
topology: v5e:2x2
jax: 0.10.0
libtpu: 0.0.40
codegen_flags: <defaults>
</compile_context>

<pallas_src>
import functools
import math

import jax
import jax.numpy as jnp
from jax import lax
from jax.experimental import pallas as pl
from jax.experimental.pallas import tpu as pltpu


def _gelu_tanh(x):
    # GELU(approximate='tanh'): 0.5*x*(1+tanh(sqrt(2/pi)*(x+0.044715*x^3)))
    c = 0.7978845608028654  # sqrt(2/pi); Python float -> jaxpr literal
    return 0.5 * x * (1.0 + jnp.tanh(c * (x + 0.044715 * x * x * x)))


def _layernorm_f32(h, gamma, beta, eps):
    mean = jnp.mean(h, axis=-1, keepdims=True)
    var = jnp.mean(jnp.square(h - mean), axis=-1, keepdims=True)
    return (h - mean) * lax.rsqrt(var + eps) * gamma + beta


# --------------------------------------------------------------------------
# Kernels
# --------------------------------------------------------------------------
def attn_block_kernel(x_ref, wqkv_ref, bqkv_ref, wo_ref, bo_ref,
                      g_ref, b_ref, o_ref, *, num_heads, eps):
    """One batch element: MHA (non-causal, no mask) + residual + LayerNorm."""
    x = x_ref[0]                                            # (S, H), native dtype
    S, H = x.shape
    hd = H // num_heads
    scale = 1.0 / math.sqrt(hd)                             # Python float

    # QKV projection (native-dtype MXU matmul, f32 accumulate).
    qkv = jnp.dot(x, wqkv_ref[...], preferred_element_type=jnp.float32)
    qkv = qkv + bqkv_ref[...].astype(jnp.float32)           # (S, 3H)
    q = qkv[:, 0 * H:1 * H]
    k = qkv[:, 1 * H:2 * H]
    v = qkv[:, 2 * H:3 * H]

    # (S, H) -> (num_heads, S, head_dim)
    q = q.reshape(S, num_heads, hd).transpose(1, 0, 2)
    k = k.reshape(S, num_heads, hd).transpose(1, 0, 2)
    v = v.reshape(S, num_heads, hd).transpose(1, 0, 2)

    s = jnp.einsum('hqd,hkd->hqk', q, k,
                   preferred_element_type=jnp.float32) * scale
    s = s - jnp.max(s, axis=-1, keepdims=True)
    p = jnp.exp(s)
    p = p / jnp.sum(p, axis=-1, keepdims=True)
    # TODO(synk): attention-probs dropout omitted (identity in eval forward).
    ctx = jnp.einsum('hqk,hkd->hqd', p, v,
                     preferred_element_type=jnp.float32)    # (nh, S, hd)
    ctx = ctx.transpose(1, 0, 2).reshape(S, H)

    attn_out = jnp.dot(ctx.astype(wo_ref.dtype), wo_ref[...],
                       preferred_element_type=jnp.float32)
    attn_out = attn_out + bo_ref[...].astype(jnp.float32)

    h = attn_out + x.astype(jnp.float32)                    # resid dropout = id
    out = _layernorm_f32(h, g_ref[...].astype(jnp.float32),
                         b_ref[...].astype(jnp.float32), eps)
    o_ref[0] = out.astype(o_ref.dtype)


def mlp_block_kernel(x_ref, w1_ref, b1_ref, w2_ref, b2_ref,
                     g_ref, b_ref, o_ref, *, eps):
    """One M-tile: fc1 -> GELU(tanh) -> fc2 -> residual -> LayerNorm."""
    x = x_ref[...]                                          # (TM, H), native dtype
    h = jnp.dot(x, w1_ref[...], preferred_element_type=jnp.float32)
    h = _gelu_tanh(h + b1_ref[...].astype(jnp.float32))
    # Second matmul in native/param dtype, f32 accumulation.
    y = jnp.dot(h.astype(w2_ref.dtype), w2_ref[...],
                preferred_element_type=jnp.float32)
    y = y + b2_ref[...].astype(jnp.float32)
    hres = y + x.astype(jnp.float32)                        # resid dropout = id
    out = _layernorm_f32(hres, g_ref[...].astype(jnp.float32),
                         b_ref[...].astype(jnp.float32), eps)
    o_ref[...] = out.astype(o_ref.dtype)


# --------------------------------------------------------------------------
# Wrapper
# --------------------------------------------------------------------------
def bert_encoder(hidden_states, params, key_padding_mask=None, *,
                 num_heads, layer_norm_eps=1e-12, block_m=256,
                 vmem_limit_bytes=32 * 1024 * 1024):
    if key_padding_mask is not None:
        # TODO(synk): key_padding_mask / unpad_input var-len path not implemented.
        raise NotImplementedError("key_padding_mask path not implemented")

    B, S, H = hidden_states.shape
    assert H % num_heads == 0
    M = B * S
    tm = block_m if (M % block_m == 0) else M
    dtype = hidden_states.dtype
    itemsize = jnp.dtype(dtype).itemsize
    I = params["layers"][0]["w1"].shape[1]
    eps = float(layer_norm_eps)

    # Fused attention block (grid over batch, megacore-parallel).
    attn_flops = B * (8 * S * H * H + 4 * S * S * H)
    attn_fn = pl.pallas_call(
        functools.partial(attn_block_kernel, num_heads=num_heads, eps=eps),
        out_shape=jax.ShapeDtypeStruct((B, S, H), dtype),
        grid=(B,),
        in_specs=[
            pl.BlockSpec((1, S, H), lambda b: (b, 0, 0)),      # x
            pl.BlockSpec((H, 3 * H), lambda b: (0, 0)),        # Wqkv
            pl.BlockSpec((1, 3 * H), lambda b: (0, 0)),        # bqkv
            pl.BlockSpec((H, H), lambda b: (0, 0)),            # Wout
            pl.BlockSpec((1, H), lambda b: (0, 0)),            # bout
            pl.BlockSpec((1, H), lambda b: (0, 0)),            # ln1 gamma
            pl.BlockSpec((1, H), lambda b: (0, 0)),            # ln1 beta
        ],
        out_specs=pl.BlockSpec((1, S, H), lambda b: (b, 0, 0)),
        compiler_params=pltpu.CompilerParams(
            dimension_semantics=("parallel",),
            vmem_limit_bytes=vmem_limit_bytes),
        cost_estimate=pl.CostEstimate(
            flops=int(attn_flops),
            transcendentals=int(B * num_heads * S * S),
            bytes_accessed=int((2 * B * S * H + 4 * H * H + 7 * H) * itemsize)),
    )

    # Fused MLP block (grid over M tiles, megacore-parallel).
    mlp_fn = pl.pallas_call(
        functools.partial(mlp_block_kernel, eps=eps),
        out_shape=jax.ShapeDtypeStruct((M, H), dtype),
        grid=(M // tm,),
        in_specs=[
            pl.BlockSpec((tm, H), lambda i: (i, 0)),           # x tile
            pl.BlockSpec((H, I), lambda i: (0, 0)),            # fc1 W
            pl.BlockSpec((1, I), lambda i: (0, 0)),            # fc1 b
            pl.BlockSpec((I, H), lambda i: (0, 0)),            # fc2 W
            pl.BlockSpec((1, H), lambda i: (0, 0)),            # fc2 b
            pl.BlockSpec((1, H), lambda i: (0, 0)),            # ln2 gamma
            pl.BlockSpec((1, H), lambda i: (0, 0)),            # ln2 beta
        ],
        out_specs=pl.BlockSpec((tm, H), lambda i: (i, 0)),
        compiler_params=pltpu.CompilerParams(
            dimension_semantics=("parallel",),
            vmem_limit_bytes=vmem_limit_bytes),
        cost_estimate=pl.CostEstimate(
            flops=int(4 * M * H * I),
            transcendentals=int(M * I),
            bytes_accessed=int((2 * M * H + 2 * H * I + I + 3 * H) * itemsize)),
    )

    h = hidden_states
    for lp in params["layers"]:
        h = attn_fn(h, lp["wqkv"], lp["bqkv"], lp["wo"], lp["bo"],
                    lp["ln1_g"], lp["ln1_b"])
        h2d = mlp_fn(h.reshape(M, H), lp["w1"], lp["b1"], lp["w2"], lp["b2"],
                     lp["ln2_g"], lp["ln2_b"])
        h = h2d.reshape(B, S, H)
    return h


# --------------------------------------------------------------------------
# Params + pure-JAX reference
# --------------------------------------------------------------------------
def init_params(key, *, num_layers, hidden_size, intermediate_size,
                dtype=jnp.float32):
    std = 0.02
    H, I = hidden_size, intermediate_size
    layers = []
    for lk in jax.random.split(key, num_layers):
        k = jax.random.split(lk, 12)
        layers.append({
            "wqkv": (jax.random.normal(k[0], (H, 3 * H)) * std).astype(dtype),
            "bqkv": (jax.random.normal(k[1], (1, 3 * H)) * std).astype(dtype),
            "wo":   (jax.random.normal(k[2], (H, H)) * std).astype(dtype),
            "bo":   (jax.random.normal(k[3], (1, H)) * std).astype(dtype),
            "ln1_g": (1.0 + 0.1 * jax.random.normal(k[4], (1, H))).astype(dtype),
            "ln1_b": (0.1 * jax.random.normal(k[5], (1, H))).astype(dtype),
            "w1":   (jax.random.normal(k[6], (H, I)) * std).astype(dtype),
            "b1":   (jax.random.normal(k[7], (1, I)) * std).astype(dtype),
            "w2":   (jax.random.normal(k[8], (I, H)) * std).astype(dtype),
            "b2":   (jax.random.normal(k[9], (1, H)) * std).astype(dtype),
            "ln2_g": (1.0 + 0.1 * jax.random.normal(k[10], (1, H))).astype(dtype),
            "ln2_b": (0.1 * jax.random.normal(k[11], (1, H))).astype(dtype),
        })
    return {"layers": layers}


def _reference_encoder(x, params, *, num_heads, eps=1e-12):
    B, S, H = x.shape
    hd = H // num_heads
    scale = 1.0 / math.sqrt(hd)
    h = x.astype(jnp.float32)
    for lp in params["layers"]:
        qkv = h @ lp["wqkv"].astype(jnp.float32) + lp["bqkv"][0]
        q, k, v = jnp.split(qkv, 3, axis=-1)
        q = q.reshape(B, S, num_heads, hd).transpose(0, 2, 1, 3)
        k = k.reshape(B, S, num_heads, hd).transpose(0, 2, 1, 3)
        v = v.reshape(B, S, num_heads, hd).transpose(0, 2, 1, 3)
        s = jnp.einsum('bhqd,bhkd->bhqk', q, k) * scale
        s = s - jnp.max(s, axis=-1, keepdims=True)
        p = jnp.exp(s)
        p = p / jnp.sum(p, axis=-1, keepdims=True)
        ctx = jnp.einsum('bhqk,bhkd->bhqd', p, v)
        ctx = ctx.transpose(0, 2, 1, 3).reshape(B, S, H)
        attn = ctx @ lp["wo"].astype(jnp.float32) + lp["bo"][0]
        h = _layernorm_f32(attn + h, lp["ln1_g"][0].astype(jnp.float32),
                           lp["ln1_b"][0].astype(jnp.float32), eps)
        mid = _gelu_tanh(h @ lp["w1"].astype(jnp.float32) + lp["b1"][0])
        y = mid @ lp["w2"].astype(jnp.float32) + lp["b2"][0]
        h = _layernorm_f32(y + h, lp["ln2_g"][0].astype(jnp.float32),
                           lp["ln2_b"][0].astype(jnp.float32), eps)
    return h.astype(x.dtype)


if __name__ == "__main__":
    B, S, H = 2, 8, 32
    num_heads = 4
    intermediate = 4 * H
    num_layers = 2

    key = jax.random.PRNGKey(0)
    k_x, k_p = jax.random.split(key)
    hidden_states = jax.random.normal(k_x, (B, S, H), jnp.float32)
    params = init_params(k_p, num_layers=num_layers, hidden_size=H,
                         intermediate_size=intermediate, dtype=jnp.float32)

    out = bert_encoder(hidden_states, params, num_heads=num_heads,
                       layer_norm_eps=1e-12)
    out = jax.block_until_ready(out)

    ref = _reference_encoder(hidden_states, params, num_heads=num_heads,
                             eps=1e-12)
    assert out.shape == (B, S, H)
    assert jnp.allclose(out, ref, atol=1e-3, rtol=1e-3), (
        float(jnp.max(jnp.abs(out - ref))))

    print("KERNEL_OK")
</pallas_src>

<mosaic_0001>
module attributes {stable_mosaic.version = 11 : i64} {
  func.func @attn_block_kernel(%arg0: i32, %arg1: memref<1x8x32xf32, #tpu.memory_space<vmem>>, %arg2: memref<32x96xf32, #tpu.memory_space<vmem>>, %arg3: memref<1x96xf32, #tpu.memory_space<vmem>>, %arg4: memref<32x32xf32, #tpu.memory_space<vmem>>, %arg5: memref<1x32xf32, #tpu.memory_space<vmem>>, %arg6: memref<1x32xf32, #tpu.memory_space<vmem>>, %arg7: memref<1x32xf32, #tpu.memory_space<vmem>>, %arg8: memref<1x8x32xf32, #tpu.memory_space<vmem>>) attributes {dimension_semantics = [#tpu.dimension_semantics<parallel>], iteration_bounds = array<i64: 2>, scalar_prefetch = 0 : i64, scratch_operands = 0 : i64, tpu.core_type = #tpu.core_type<tc>, window_params = [{transform_indices = @transform_0, window_bounds = array<i64: 1, 8, 32>}, {pipeline_mode = #tpu.pipeline_mode<synchronous>, transform_indices = @transform_1, window_bounds = array<i64: 32, 96>}, {pipeline_mode = #tpu.pipeline_mode<synchronous>, transform_indices = @transform_2, window_bounds = array<i64: 1, 96>}, {pipeline_mode = #tpu.pipeline_mode<synchronous>, transform_indices = @transform_3, window_bounds = array<i64: 32, 32>}, {pipeline_mode = #tpu.pipeline_mode<synchronous>, transform_indices = @transform_4, window_bounds = array<i64: 1, 32>}, {pipeline_mode = #tpu.pipeline_mode<synchronous>, transform_indices = @transform_5, window_bounds = array<i64: 1, 32>}, {pipeline_mode = #tpu.pipeline_mode<synchronous>, transform_indices = @transform_6, window_bounds = array<i64: 1, 32>}, {transform_indices = @transform_7, window_bounds = array<i64: 1, 8, 32>}]} {
    %c0 = arith.constant 0 : index
    %c0_0 = arith.constant 0 : index
    %c0_1 = arith.constant 0 : index
    %0 = vector.load %arg1[%c0, %c0_0, %c0_1] : memref<1x8x32xf32, #tpu.memory_space<vmem>>, vector<1x8x32xf32>
    %1 = vector.shape_cast %0 : vector<1x8x32xf32> to vector<8x32xf32>
    %c0_2 = arith.constant 0 : index
    %c0_3 = arith.constant 0 : index
    %2 = vector.load %arg2[%c0_2, %c0_3] : memref<32x96xf32, #tpu.memory_space<vmem>>, vector<32x96xf32>
    %cst = arith.constant dense<0.000000e+00> : vector<8x96xf32>
    %3 = tpu.matmul %1, %2, %cst {dimension_numbers = #tpu.dot_dimension_numbers<[1], [0], [0], [1], [0, 0, 1, 1], [], []>} : vector<8x32xf32>, vector<32x96xf32>, vector<8x96xf32> -> vector<8x96xf32>
    %c0_4 = arith.constant 0 : index
    %c0_5 = arith.constant 0 : index
    %4 = vector.load %arg3[%c0_4, %c0_5] : memref<1x96xf32, #tpu.memory_space<vmem>>, vector<1x96xf32>
    %5 = vector.broadcast %4 : vector<1x96xf32> to vector<8x96xf32>
    %6 = arith.addf %3, %5 : vector<8x96xf32>
    %7 = vector.extract_strided_slice %6 {offsets = [0, 0], sizes = [8, 32], strides = [1, 1]} : vector<8x96xf32> to vector<8x32xf32>
    %8 = vector.extract_strided_slice %6 {offsets = [0, 32], sizes = [8, 32], strides = [1, 1]} : vector<8x96xf32> to vector<8x32xf32>
    %9 = vector.extract_strided_slice %6 {offsets = [0, 64], sizes = [8, 32], strides = [1, 1]} : vector<8x96xf32> to vector<8x32xf32>
    %10 = vector.shape_cast %7 : vector<8x32xf32> to vector<8x4x8xf32>
    %11 = tpu.transpose %10, [1, 0, 2] : vector<8x4x8xf32> -> vector<4x8x8xf32>
    %12 = vector.shape_cast %8 : vector<8x32xf32> to vector<8x4x8xf32>
    %13 = tpu.transpose %12, [1, 0, 2] : vector<8x4x8xf32> -> vector<4x8x8xf32>
    %14 = vector.shape_cast %9 : vector<8x32xf32> to vector<8x4x8xf32>
    %15 = tpu.transpose %14, [1, 0, 2] : vector<8x4x8xf32> -> vector<4x8x8xf32>
    "tpu.trace_start"() <{level = 10 : i32, message = "hqd,hkd->hqk"}> : () -> ()
    %cst_6 = arith.constant dense<0.000000e+00> : vector<4x8x8xf32>
    %16 = tpu.matmul %11, %13, %cst_6 {dimension_numbers = #tpu.dot_dimension_numbers<[2], [2], [1], [1], [0, 0, 0, 1, 1, 1], [0], [0]>} : vector<4x8x8xf32>, vector<4x8x8xf32>, vector<4x8x8xf32> -> vector<4x8x8xf32>
    "tpu.trace_stop"() : () -> ()
    %cst_7 = arith.constant 0.353553385 : f32
    %17 = vector.broadcast %cst_7 : f32 to vector<4x8x8xf32>
    %18 = arith.mulf %16, %17 : vector<4x8x8xf32>
    %cst_8 = arith.constant dense<0xFF800000> : vector<4x8xf32>
    %19 = vector.multi_reduction <maximumf>, %18, %cst_8 [2] : vector<4x8x8xf32> to vector<4x8xf32>
    %20 = vector.shape_cast %19 : vector<4x8xf32> to vector<4x8x1xf32>
    %21 = vector.broadcast %20 : vector<4x8x1xf32> to vector<4x8x8xf32>
    %22 = arith.subf %18, %21 : vector<4x8x8xf32>
    %23 = math.exp %22 : vector<4x8x8xf32>
    %cst_9 = arith.constant dense<0.000000e+00> : vector<4x8xf32>
    %24 = vector.multi_reduction <add>, %23, %cst_9 [2] : vector<4x8x8xf32> to vector<4x8xf32>
    %25 = vector.shape_cast %24 : vector<4x8xf32> to vector<4x8x1xf32>
    %26 = vector.broadcast %25 : vector<4x8x1xf32> to vector<4x8x8xf32>
    %27 = arith.divf %23, %26 : vector<4x8x8xf32>
    "tpu.trace_start"() <{level = 10 : i32, message = "hqk,hkd->hqd"}> : () -> ()
    %cst_10 = arith.constant dense<0.000000e+00> : vector<4x8x8xf32>
    %28 = tpu.matmul %27, %15, %cst_10 {dimension_numbers = #tpu.dot_dimension_numbers<[2], [1], [1], [2], [0, 0, 0, 1, 1, 2], [0], [0]>} : vector<4x8x8xf32>, vector<4x8x8xf32>, vector<4x8x8xf32> -> vector<4x8x8xf32>
    "tpu.trace_stop"() : () -> ()
    %29 = tpu.transpose %28, [1, 0, 2] : vector<4x8x8xf32> -> vector<8x4x8xf32>
    %30 = vector.shape_cast %29 : vector<8x4x8xf32> to vector<8x32xf32>
    %c0_11 = arith.constant 0 : index
    %c0_12 = arith.constant 0 : index
    %31 = vector.load %arg4[%c0_11, %c0_12] : memref<32x32xf32, #tpu.memory_space<vmem>>, vector<32x32xf32>
    %cst_13 = arith.constant dense<0.000000e+00> : vector<8x32xf32>
    %32 = tpu.matmul %30, %31, %cst_13 {dimension_numbers = #tpu.dot_dimension_numbers<[1], [0], [0], [1], [0, 0, 1, 1], [], []>} : vector<8x32xf32>, vector<32x32xf32>, vector<8x32xf32> -> vector<8x32xf32>
    %c0_14 = arith.constant 0 : index
    %c0_15 = arith.constant 0 : index
    %33 = vector.load %arg5[%c0_14, %c0_15] : memref<1x32xf32, #tpu.memory_space<vmem>>, vector<1x32xf32>
    %34 = vector.broadcast %33 : vector<1x32xf32> to vector<8x32xf32>
    %35 = arith.addf %32, %34 : vector<8x32xf32>
    %36 = arith.addf %35, %1 : vector<8x32xf32>
    %c0_16 = arith.constant 0 : index
    %c0_17 = arith.constant 0 : index
    %37 = vector.load %arg6[%c0_16, %c0_17] : memref<1x32xf32, #tpu.memory_space<vmem>>, vector<1x32xf32>
    %c0_18 = arith.constant 0 : index
    %c0_19 = arith.constant 0 : index
    %38 = vector.load %arg7[%c0_18, %c0_19] : memref<1x32xf32, #tpu.memory_space<vmem>>, vector<1x32xf32>
    %cst_20 = arith.constant dense<0.000000e+00> : vector<8xf32>
    %39 = vector.multi_reduction <add>, %36, %cst_20 [1] : vector<8x32xf32> to vector<8xf32>
    %40 = vector.shape_cast %39 : vector<8xf32> to vector<8x1xf32>
    %cst_21 = arith.constant 3.200000e+01 : f32
    %41 = vector.broadcast %cst_21 : f32 to vector<8x1xf32>
    %42 = arith.divf %40, %41 : vector<8x1xf32>
    %43 = vector.broadcast %42 : vector<8x1xf32> to vector<8x32xf32>
    %44 = arith.subf %36, %43 : vector<8x32xf32>
    %45 = arith.mulf %44, %44 : vector<8x32xf32>
    %cst_22 = arith.constant dense<0.000000e+00> : vector<8xf32>
    %46 = vector.multi_reduction <add>, %45, %cst_22 [1] : vector<8x32xf32> to vector<8xf32>
    %47 = vector.shape_cast %46 : vector<8xf32> to vector<8x1xf32>
    %cst_23 = arith.constant 3.200000e+01 : f32
    %48 = vector.broadcast %cst_23 : f32 to vector<8x1xf32>
    %49 = arith.divf %47, %48 : vector<8x1xf32>
    %50 = vector.broadcast %42 : vector<8x1xf32> to vector<8x32xf32>
    %51 = arith.subf %36, %50 : vector<8x32xf32>
    %cst_24 = arith.constant 9.99999996E-13 : f32
    %52 = vector.broadcast %cst_24 : f32 to vector<8x1xf32>
    %53 = arith.addf %49, %52 : vector<8x1xf32>
    %54 = math.rsqrt %53 : vector<8x1xf32>
    %55 = vector.broadcast %54 : vector<8x1xf32> to vector<8x32xf32>
    %56 = arith.mulf %51, %55 : vector<8x32xf32>
    %57 = vector.broadcast %37 : vector<1x32xf32> to vector<8x32xf32>
    %58 = arith.mulf %56, %57 : vector<8x32xf32>
    %59 = vector.broadcast %38 : vector<1x32xf32> to vector<8x32xf32>
    %60 = arith.addf %58, %59 : vector<8x32xf32>
    %c0_25 = arith.constant 0 : index
    %c0_26 = arith.constant 0 : index
    %c0_27 = arith.constant 0 : index
    %61 = vector.load %arg8[%c0_25, %c0_26, %c0_27] : memref<1x8x32xf32, #tpu.memory_space<vmem>>, vector<1x8x32xf32>
    %62 = vector.shape_cast %61 : vector<1x8x32xf32> to vector<8x32xf32>
    %63 = vector.shape_cast %60 : vector<8x32xf32> to vector<1x8x32xf32>
    tpu.vector_store %arg8[%c0_25, %c0_26, %c0_27], %63 {strides = array<i32>} : memref<1x8x32xf32, #tpu.memory_space<vmem>>, vector<1x8x32xf32>,
    return
  }
  func.func @transform_0(%arg0: i32) -> (i32, i32, i32) {
    %c0_i32 = arith.constant 0 : i32
    %c0_i32_0 = arith.constant 0 : i32
    %c0_i32_1 = arith.constant 0 : i32
    return %arg0, %c0_i32, %c0_i32_0 : i32, i32, i32
  }
  func.func @transform_1(%arg0: i32) -> (i32, i32) {
    %c0_i32 = arith.constant 0 : i32
    %c0_i32_0 = arith.constant 0 : i32
    %c0_i32_1 = arith.constant 0 : i32
    return %c0_i32, %c0_i32_0 : i32, i32
  }
  func.func @transform_2(%arg0: i32) -> (i32, i32) {
    %c0_i32 = arith.constant 0 : i32
    %c0_i32_0 = arith.constant 0 : i32
    %c0_i32_1 = arith.constant 0 : i32
    return %c0_i32, %c0_i32_0 : i32, i32
  }
  func.func @transform_3(%arg0: i32) -> (i32, i32) {
    %c0_i32 = arith.constant 0 : i32
    %c0_i32_0 = arith.constant 0 : i32
    %c0_i32_1 = arith.constant 0 : i32
    return %c0_i32, %c0_i32_0 : i32, i32
  }
  func.func @transform_4(%arg0: i32) -> (i32, i32) {
    %c0_i32 = arith.constant 0 : i32
    %c0_i32_0 = arith.constant 0 : i32
    %c0_i32_1 = arith.constant 0 : i32
    return %c0_i32, %c0_i32_0 : i32, i32
  }
  func.func @transform_5(%arg0: i32) -> (i32, i32) {
    %c0_i32 = arith.constant 0 : i32
    %c0_i32_0 = arith.constant 0 : i32
    %c0_i32_1 = arith.constant 0 : i32
    return %c0_i32, %c0_i32_0 : i32, i32
  }
  func.func @transform_6(%arg0: i32) -> (i32, i32) {
    %c0_i32 = arith.constant 0 : i32
    %c0_i32_0 = arith.constant 0 : i32
    %c0_i32_1 = arith.constant 0 : i32
    return %c0_i32, %c0_i32_0 : i32, i32
  }
  func.func @transform_7(%arg0: i32) -> (i32, i32, i32) {
    %c0_i32 = arith.constant 0 : i32
    %c0_i32_0 = arith.constant 0 : i32
    %c0_i32_1 = arith.constant 0 : i32
    return %arg0, %c0_i32, %c0_i32_0 : i32, i32, i32
  }
}

</mosaic_0001>

<bundles_post_ra>
// kernel: tpu_custom_call.1
= control target key start
LH: loop header
LB: loop body
LE: loop exit
PB: predicated region body
PF: predicated region fallthrough
CT: control target
= control target key end

     0   :  { %s2087_s0 = inlined_call_operand.hbm [shape: f32[2,8,32], index: 0, kind: input, shape index: {}]   ;;  %s2088_s1 = inlined_call_operand.hbm [shape: f32[32,96], index: 1, kind: input, shape index: {}]   ;;  %s2089_s2 = inlined_call_operand.vmem [shape: f32[1,96], index: 2, kind: input, shape index: {}]   ;;  %s2090_s3 = inlined_call_operand.hbm [shape: f32[32,32], index: 3, kind: input, shape index: {}]   ;;  %s2091_s4 = inlined_call_operand.vmem [shape: f32[1,32], index: 4, kind: input, shape index: {}]   ;;  %s2092_s5 = inlined_call_operand.vmem [shape: f32[1,32], index: 5, kind: input, shape index: {}]   ;;  %s2093_s6 = inlined_call_operand.vmem [shape: f32[1,32], index: 6, kind: input, shape index: {}]   ;;  %s2094_s7 = inlined_call_operand.hbm [shape: f32[2,8,32], index: 7, kind: output, shape index: {}]  }
   0x1   :  { %2095 = sst [smem:[#allocation12_spill]] %s2088_s1 }
   0x2   :  { %2096 = sst [smem:[#allocation13_spill]] %s2090_s3 }
   0x3   :  { %12 = vsyncpa [#allocation3], 0 }
   0x4   :  { %14 = vsyncpa [#allocation3 + $0x1], 0 }
   0x5   :  { %15 = vsyncpa [#allocation6], 0 }
   0x6   :  { %16 = vsyncpa [#allocation4], 0 }
   0x7   :  { %18 = vsyncpa [#allocation4 + $0x1], 0  ;;  %s1689_s24 = smov 0   ;;  %s1691_s25 = smov 0  }
   0x8   :  { %s1693_s26 = smov 0   ;;  %s1695_s27 = smov 0  }
   0x9 LB: > { %s2097_s1 = sld [smem:[#allocation12_spill]]  ;;  %s1713_s8 = sadd.s32 4294967295, %s1632_s27   ;;  %s1632_s27 = sphi %s1695_s27, %s2109_s27   ;;  %s1628_s26 = sphi %s1693_s26, %s2108_s26   ;;  %s1624_s25 = sphi %s1691_s25, %s2107_s25   ;;  %s1620_s24 = sphi %s1689_s24, %s2106_s24  }
   0xa   : > { %p1329_p0 = scmp.ge.s32.totalorder %s1632_s27, 1  ;;  %p45_p1 = scmp.eq.s32.totalorder %s1713_s8, 0 }
   0xb   : > { %p207_p2 = scmp.lt.s32.totalorder %s1632_s27, 3  ;;  %s1634_s10 = smov [#allocation5]  }
   0xc   : > { %s220_s11 = sshll.u32 %s1634_s10, 4  ;;  %s2099_s3 = sld [smem:[#allocation13_spill]]  ;;  %s221_s11 = int_to_ptr.vmem [resolvable:$true] %s220_s11 }
   0xd   : > { %p1718_p3 = pnand %p1329_p0, %p207_p2  ;;  %s1635_s15 = smov [#allocation7]  }
   0xe   : > { %s237_s16 = sshll.u32 %s1635_s15, 4  ;;  %s1636_s17 = smov 128   ;;  %s238_s16 = int_to_ptr.vmem [resolvable:$true] %s237_s16 }
   0xf   : > { %s218_s30 = sshll.u32 %s2097_s1, 4  ;;  %p1370_p4 = pneg %p1718_p3  ;;  %s219_s30 = int_to_ptr.hbm [resolvable:$true] %s218_s30 }
  0x10   : > { %s1637_s18 = smov 8   ;;  %s1328_s19 = sadd.s32 4294967294, %s1632_s27  }
  0x11   : > { %p1371_p6 = pnand %p1370_p4, %p45_p1  ;;  %s1732_s20 = sadd.s32 1, %s1632_s27  }
  0x12   : > { %s235_s14 = sshll.u32 %s2099_s3, 4  ;;  %s28_s21 = ssub.s32 %s1632_s27, %s1732_s20  ;;  %s236_s14 = int_to_ptr.hbm [resolvable:$true] %s235_s14 }
  0x13   : > { %1373 = dma.hbm_to_vmem [thread:$0]  (!%p1371_p6), %s219_s30, 512, %s221_s11, [#allocation6], %s1636_s17, %s1636_s17, %s1637_s18  }
  0x14   : > { %1376 = dma.hbm_to_vmem [thread:$0]  (!%p1371_p6), %s236_s14, 512, %s238_s16, [#allocation6], %s1636_s17, %s1636_s17, %s1637_s18  }
  0x15   : > { %s31_s22 = sadd.s32 1, %s1628_s26  ;;  %p29_p7 = scmp.eq.s32.totalorder %s28_s21, 0 }
  0x16   : > { %p38_p8 = scmp.ne.s32.totalorder %s1628_s26, %s1624_s25  ;;  %p39_p9 = scmp.eq.s32.totalorder %s1632_s27, 0 }
  0x17   : > { %p44_p10 = scmp.ne.s32.totalorder %s1624_s25, %s1620_s24  ;;  %p194_p13 = scmp.eq.s32.totalorder %s1713_s8, 1 }
  0x18   : > { %s1743_s23 = scalar_select %p29_p7, %s1628_s26, %s31_s22  }
  0x19   : > { %p1745_p11 = por %p39_p9, %p38_p8  ;;  %p1751_p12 = por %p45_p1, %p44_p10 }
  0x1a   : > { %p200_p0 = scmp.eq.s32.totalorder %s1328_s19, 1  ;;  %p1387_p2 = scmp.lt.s32.totalorder %s1632_s27, 2 }
  0x1b   : > { %s260_s30 = sand.u32 1, %s1628_s26   ;;  %p1758_p4 = por %p194_p13, %p38_p8 }
  0x1c   : > { %p1762_p6 = por %p200_p0, %p44_p10  ;;  %s1333_s12 = sshll.u32 %s260_s30, 3 }
  0x1d   : > { %s1334_s13 = sshll.u32 %s1632_s27, 3  ;;  %s264_s17 = scalar_lea.vmem [#allocation2], %s1333_s12 }
  0x1e   : > { %s268_s16 = scalar_lea.hbm %s2087_s0, %s1334_s13  ;;  %s272_s18 = sshll.u32 %s264_s17, 4  ;;  %s273_s18 = int_to_ptr.vmem [resolvable:$true] %s272_s18 }
  0x1f   : > { %s270_s21 = sshll.u32 %s268_s16, 4  ;;  %p1772_p7 = pnand %p1387_p2, %p1745_p11  ;;  %s271_s21 = int_to_ptr.hbm [resolvable:$true] %s270_s21 }
  0x20   : > { %s261_s22 = scalar_lea.sflag [#allocation3], %s260_s30  ;;  %s1532_s1 = sshra.s32 %s271_s21, 4  ;;  %s1533_s1 = int_to_ptr.hbm [resolvable:$true] %s1532_s1 }
  0x21   : > { %s1534_s3 = scalar_lea.hbm %s1533_s1, 8  ;;  %p1536_p9 = pneg %p1772_p7 }
  0x22   : > { %p1535_p8 = scmp.ne.s32.totalorder %s1533_s1, %s1534_s3  ;;  %s1539_s14 = scalar_lea.hbm %s2087_s0, 16 }
  0x23   : > { %p1540_p11 = scmp.lt.s32.totalorder %s1533_s1, %s2087_s0  ;;  %p1541_p0 = scmp.lt.s32.totalorder %s1539_s14, %s1534_s3 }
  0x24   : > { %p1537_p10 = pnand %p1536_p9, %p1535_p8 }
  0x25   : > { %p1542_p2 = por %p1541_p0, %p1540_p11 }
  0x26   : > { %p1538_p13 = pneg %p1537_p10 }
  0x28   : > { %p1543_p5 = pnand %p1542_p2, %p1538_p13 }
  0x2a   : > { %1546 = shalt.err (!%p1543_p5)
}
  0x2b   : > { %1380 = dma.hbm_to_vmem [thread:$0]  (!%p1772_p7), %s271_s21, 128, %s273_s18, %s261_s22  }
  0x2c   : > { %281 = sbr.rel (%p1718_p3) target bundleno = 1526 (0x5f6), region = 48  ;;  %s1789_s30 = sand.u32 (!%p1718_p3), 1, %s1624_s25  }
  0x2d   : > { %s1336_s16 = sshll.u32 (!%p1718_p3), %s1789_s30, 3  ;;  %s284_s17 = scalar_lea.sflag (!%p1718_p3), [#allocation3], %s1789_s30 }
  0x2e   : > { %s287_s1 = scalar_lea.vmem (!%p1718_p3), [#allocation2], %s1336_s16 }
  0x31   : > { %1607 = dma.done.wait (%p1751_p12), %s284_s17, 128  }
  0x32   : > { %1609 = vsyncadd (%p1751_p12), %s284_s17, 4294967168 }
  0x33   : > { %1611 = dma.done.wait (%p45_p1), [#allocation6], 1024  }
  0x34   : > { %1613 = vsyncadd (%p45_p1), [#allocation6], 4294966272  ;;  %v333_v0 = vld [vmem:[#allocation5 + $0x18] sm:$0xff]  ;;  %v332_v1 = vld [vmem:[#allocation5 + $0x10] sm:$0xff]  ;;  %vm338_vm0 = vcmask 261120   ;;  %s1638_s29 = smov 96  }
  0x35   : > { %354 = vmatpush.msra.mxu0 %v333_v0  ;;  %v331_v2 = vld [vmem:[#allocation5 + $0x8] sm:$0xff]  ;;  %v330_v3 = vld [vmem:[#allocation5] sm:$0xff]  ;;  %v1803_v4 = vld [vmem:[%s287_s1] sm:$0xff]  ;;  %s1639_s18 = smov 120   ;;  %s1640_s21 = smov 112   ;;  %vm373_vm1 = vcmask 1047556  }
  0x36   : > { %v1448_v5 = vld [vmem:[%s2089_s2] ss:$0 sm:$0xff]  ;;  %s1641_s19 = smov 104   ;;  %v1642_v11 = vmov 1983009808   ;;  %vm727_vm2 = vcmask 64512  }
  0x37   : > { %355 = vmatpush.msra.mxu0 %v332_v1  ;;  %v378_v12 = vunpack.c.l.s4 %v1642_v11  ;;  %v1643_v22 = vmov 1934713408   ;;  %s1644_s22 = smov 64   ;;  %s1645_s12 = smov 16  }
  0x38   : > { %v402_v23 = vunpack.c.l.s4 %v1643_v22  ;;  %s1646_s13 = smov 8   ;;  %s1647_s14 = smov 24  }
  0x39   : > { %356 = vmatpush.msra.mxu0 %v331_v2  ;;  %v1827_v15 = vunpack.c.0.s8 %v378_v12  ;;  %s1355_s17 = sshll.u32 %s1713_s8, 3  ;;  %s328_s8 = scalar_lea.vmem [#allocation8], %s1336_s16 }
  0x3a   : > { %v1843_v29 = vunpack.c.0.s8 %v402_v23  ;;  %s1582_s16 = scalar_lea.hbm %s2094_s7, 16 }
  0x3b   : > { %357 = vmatpush.msra.mxu0 %v330_v3 }
  0x3c   : > { %1340 = vmatmul.msk.f32.vlgmr.msra.gmra.mxu0 %vm338_vm0, %v1803_v4 }
  0xb9   : > { %v359_v6 = vpop.f32.mrf.mxu0 }
  0xba   : > { %v1810_v7 = vadd.f32 %v1448_v5, %v359_v6 }
  0xbc   : > { %483 = vrot.lane.b32.xlu2 %v1810_v7, %s1638_s29  ;;  %363 = vrot.lane.b32.xlu1 %v1810_v7, %s1639_s18  ;;  %v375_v14 = vrot.slane %v1810_v7, 4  ;;  %s1234_s18 = scalar_lea.hbm %s2094_s7, %s1355_s17 }
  0xbd   : > { %366 = vrot.lane.b32.xlu0 %v1810_v7, %s1640_s21 }
  0xc5   : > { %369 = vrot.lane.b32.xlu0 %v1810_v7, %s1641_s19 }
 0x116   : > { %v484_v33 = vpop.permute.xlu2 %483 }
 0x117   : > { %v497_v48 = vrot.slane %v484_v33, 4 }
 0x12e   : > { %v1816_v8 = vpop.permute.xlu1 %363 }
 0x12f   : > { %v1818_v9 = vpop.permute.xlu0 %366  ;;  %485 = vrot.lane.b32.xlu0 %v1816_v8, %s1638_s29  ;;  %v387_v16 = vrot.slane %v1816_v8, 4 }
 0x130   : > { %487 = vrot.lane.b32.xlu1 %v1818_v9, %s1638_s29  ;;  %v372_v13 = vrot.slane %v1818_v9, 4  ;;  %v376_v17 = vsel %vm373_vm1, %v1818_v9, %v375_v14 }
 0x131   : > { %v384_v21 = vperm.slane %v376_v17, %v1827_v15 }
 0x132   : > { %v374_v19 = vsel %vm373_vm1, %v372_v13, %v1810_v7 }
 0x133   : > { %v380_v25 = vperm.slane %v374_v19, %v1827_v15  ;;  %v411_v27 = vrot.slane %v384_v21, 4 }
 0x135   : > { %v399_v30 = vrot.slane %v380_v25, 4 }
 0x137   : > { %v1822_v10 = vpop.permute.xlu0 %369 }
 0x138   : > { %489 = vrot.lane.b32.xlu2 %v1822_v10, %s1638_s29  ;;  %v385_v18 = vrot.slane %v1822_v10, 4  ;;  %v388_v20 = vsel %vm373_vm1, %v1822_v10, %v387_v16 }
 0x139   : > { %v396_v26 = vperm.slane %v388_v20, %v1827_v15 }
 0x13a   : > { %v386_v24 = vsel %vm373_vm1, %v385_v18, %v1816_v8 }
 0x13b   : > { %v392_v28 = vperm.slane %v386_v24, %v1827_v15  ;;  %v409_v31 = vrot.slane %v396_v26, 4  ;;  %v412_v32 = vsel %vm373_vm1, %v396_v26, %v411_v27 }
 0x13c   : > { %v420_v36 = vperm.slane %v412_v32, %v1843_v29 }
 0x13d   : > { %v397_v34 = vrot.slane %v392_v28, 4  ;;  %v400_v35 = vsel %vm373_vm1, %v392_v28, %v399_v30  ;;  %v410_v37 = vsel %vm373_vm1, %v409_v31, %v384_v21 }
 0x13e   : > { %v408_v38 = vperm.slane %v400_v35, %v1843_v29  ;;  %v416_v40 = vperm.slane %v410_v37, %v1843_v29  ;;  %v427_v41 = vrot.slane %v420_v36, 4 }
 0x13f   : > { %v398_v39 = vsel %vm373_vm1, %v397_v34, %v380_v25 }
 0x140   : > { %v404_v42 = vperm.slane %v398_v39, %v1843_v29  ;;  %v423_v43 = vrot.slane %v408_v38, 4  ;;  %v425_v45 = vrot.slane %v416_v40, 4  ;;  %v428_v46 = vsel %vm373_vm1, 0.0, %v427_v41 }
 0x141   : > { %v445_v52 = vrot.slane %v428_v46, 4  ;;  %v440_v56 = vsel %vm373_vm1, %v427_v41, %v416_v40 }
 0x142   : > { %v421_v50 = vrot.slane %v404_v42, 4  ;;  %v424_v51 = vsel %vm373_vm1, 0.0, %v423_v43  ;;  %v426_v60 = vsel %vm373_vm1, 0.0, %v425_v45  ;;  %v429_v63 = vsel %vm373_vm1, %v423_v43, %v404_v42 }
 0x143   : > { %v434_v0 = vrot.slane %v424_v51, 4  ;;  %v433_v13 = vperm.slane %v429_v63, %v1827_v15  ;;  %v444_v14 = vperm.slane %v440_v56, %v1827_v15  ;;  %v446_v16 = vsel %vm373_vm1, %v445_v52, %v426_v60 }
 0x144   : > { %v422_v5 = vsel %vm373_vm1, 0.0, %v421_v50  ;;  %v450_v26 = vperm.slane %v446_v16, %v1827_v15 }
 0x145   : > { %v435_v20 = vsel %vm373_vm1, %v434_v0, %v422_v5  ;;  %v465_v31 = vrot.slane %v444_v14, 4 }
 0x146   : > { %v439_v30 = vperm.slane %v435_v20, %v1827_v15  ;;  %v463_v41 = vrot.slane %v450_v26, 4 }
 0x148   : > { %v451_v45 = vrot.slane %v439_v30, 4 }
 0x192   : > { %v490_v44 = vpop.permute.xlu2 %489 }
 0x193   : > { %v507_v47 = vrot.slane %v490_v44, 4 }
 0x1a1   : > { %v486_v49 = vpop.permute.xlu0 %485 }
 0x1a2   : > { %v488_v53 = vpop.permute.xlu1 %487  ;;  %v508_v54 = vsel %vm373_vm1, %v507_v47, %v486_v49  ;;  %v509_v55 = vrot.slane %v486_v49, 4 }
 0x1a3   : > { %v495_v57 = vrot.slane %v488_v53, 4  ;;  %v498_v58 = vsel %vm373_vm1, %v488_v53, %v497_v48  ;;  %v514_v59 = vperm.slane %v508_v54, %v1827_v15  ;;  %v464_v54 = vsel %vm373_vm1, %v463_v41, %v444_v14 }
 0x1a4   : > { %v506_v61 = vperm.slane %v498_v58, %v1827_v15  ;;  %v510_v62 = vsel %vm373_vm1, %v490_v44, %v509_v55  ;;  %v466_v44 = vsel %vm373_vm1, %v450_v26, %v465_v31 }
 0x1a5   : > { %v496_v1 = vsel %vm373_vm1, %v495_v57, %v484_v33  ;;  %v518_v2 = vperm.slane %v510_v62, %v1827_v15  ;;  %v519_v3 = vrot.slane %v514_v59, 4  ;;  %v453_v33 = vrot.slane %v433_v13, 4 }
 0x1a6   : > { %v502_v6 = vperm.slane %v496_v1, %v1827_v15  ;;  %v533_v11 = vrot.slane %v506_v61, 4  ;;  %v474_v58 = vperm.slane %v466_v44, %v1843_v29  ;;  %v470_v1 = vperm.slane %v464_v54, %v1843_v29 }
 0x1a7   : > { %v531_v12 = vrot.slane %v518_v2, 4  ;;  %v454_v60 = vsel %vm373_vm1, %v439_v30, %v453_v33  ;;  %v1443_v44 = vpack.i.bf16 %v1822_v10, %v1818_v9 }
 0x1a8   : > { %v521_v17 = vrot.slane %v502_v6, 4  ;;  %v520_v18 = vsel %vm373_vm1, %v519_v3, %v502_v6  ;;  %v534_v19 = vsel %vm373_vm1, %v518_v2, %v533_v11  ;;  %v462_v11 = vperm.slane %v454_v60, %v1843_v29 }
 0x1a9   : > { %v526_v21 = vperm.slane %v520_v18, %v1843_v29  ;;  %v532_v22 = vsel %vm373_vm1, %v531_v12, %v506_v61  ;;  %v542_v23 = vperm.slane %v534_v19, %v1843_v29  ;;  %v452_v61 = vsel %vm373_vm1, %v451_v45, %v433_v13 }
 0x1aa   : > { %v522_v24 = vsel %vm373_vm1, %v514_v59, %v521_v17  ;;  %v538_v25 = vperm.slane %v532_v22, %v1843_v29  ;;  %v479_v12 = vrot.slane %v474_v58, 4  ;;  %v458_v13 = vperm.slane %v452_v61, %v1843_v29 }
 0x1ab   : > { %v530_v27 = vperm.slane %v522_v24, %v1843_v29  ;;  %v549_v28 = vrot.slane %v542_v23, 4  ;;  %v543_v34 = vrot.slane %v526_v21, 4  ;;  %v475_v19 = vrot.slane %v470_v1, 4 }
 0x1ac   : > { %v547_v32 = vrot.slane %v538_v25, 4  ;;  %v480_v23 = vsel %vm373_vm1, %v479_v12, %v462_v11  ;;  %v477_v24 = vrot.slane %v458_v13, 4 }
 0x1ad   : > { %v545_v35 = vrot.slane %v530_v27, 4  ;;  %v550_v36 = vsel %vm373_vm1, 0.0, %v549_v28  ;;  %v562_v37 = vsel %vm373_vm1, %v549_v28, %v538_v25  ;;  %v544_v50 = vsel %vm373_vm1, 0.0, %v543_v34 }
 0x1ae   : > { %v567_v38 = vrot.slane %v550_v36, 4  ;;  %v548_v39 = vsel %vm373_vm1, 0.0, %v547_v32  ;;  %v566_v40 = vperm.slane %v562_v37, %v1827_v15  ;;  %v476_v26 = vsel %vm373_vm1, %v475_v19, %v458_v13 }
 0x1af   : > { %v546_v42 = vsel %vm373_vm1, 0.0, %v545_v35  ;;  %v551_v43 = vsel %vm373_vm1, %v545_v35, %v526_v21  ;;  %v478_v27 = vsel %vm373_vm1, %v470_v1, %v477_v24  ;;  %v481_v28 = vrot.slane %v462_v11, 4 }
 0x1b0   : > { %v556_v46 = vrot.slane %v546_v42, 4  ;;  %v555_v47 = vperm.slane %v551_v43, %v1827_v15  ;;  %v568_v48 = vsel %vm373_vm1, %v567_v38, %v548_v39  ;;  %v587_v49 = vrot.slane %v566_v40, 4 }
 0x1b1   : > { %v572_v51 = vperm.slane %v568_v48, %v1827_v15  ;;  %v482_v30 = vsel %vm373_vm1, %v474_v58, %v481_v28  ;;  %v1438_v43 = vpack.i.bf16 %v1816_v8, %v1810_v7 }
 0x1b2   : > { %v557_v52 = vsel %vm373_vm1, %v556_v46, %v544_v50  ;;  %v575_v53 = vrot.slane %v555_v47, 4 }
 0x1b3   : > { %v561_v55 = vperm.slane %v557_v52, %v1827_v15  ;;  %v588_v56 = vsel %vm373_vm1, %v572_v51, %v587_v49  ;;  %v585_v57 = vrot.slane %v572_v51, 4 }
 0x1b4   : > { %v596_v59 = vperm.slane %v588_v56, %v1843_v29 }
 0x1b5   : > { %v576_v62 = vsel %vm373_vm1, %v561_v55, %v575_v53  ;;  %v573_v63 = vrot.slane %v561_v55, 4  ;;  %v586_v0 = vsel %vm373_vm1, %v585_v57, %v566_v40 }
 0x1b6   : > { %v584_v2 = vperm.slane %v576_v62, %v1843_v29  ;;  %v601_v3 = vrot.slane %v596_v59, 4  ;;  %v592_v5 = vperm.slane %v586_v0, %v1843_v29 }
 0x1b7   : > { %v574_v6 = vsel %vm373_vm1, %v573_v63, %v555_v47 }
 0x1b8   : > { %v602_v14 = vsel %vm373_vm1, %v601_v3, %v584_v2  ;;  %v580_v16 = vperm.slane %v574_v6, %v1843_v29  ;;  %v597_v17 = vrot.slane %v592_v5, 4  ;;  %v603_v18 = vrot.slane %v584_v2, 4 }
 0x1b9   : > { %1345 = vmatpush.xpose.msk.msra.mxu3 %vm727_vm2, %v602_v14 }
 0x1ba   : > { %v598_v20 = vsel %vm373_vm1, %v597_v17, %v580_v16  ;;  %v604_v21 = vsel %vm373_vm1, %v596_v59, %v603_v18  ;;  %v599_v22 = vrot.slane %v580_v16, 4 }
 0x1bb   : > { %1341 = vmatpush.xpose.msk.msra.mxu1 %vm727_vm2, %v598_v20 }
 0x1bc   : > { %1346 = vmatmul.msk.f32.vlgmr.msra.gmra.mxu3 %vm727_vm2, %v480_v23  ;;  %v600_v25 = vsel %vm373_vm1, %v592_v5, %v599_v22 }
 0x1bd   : > { %1343 = vmatpush.xpose.msk.msra.mxu2 %vm727_vm2, %v600_v25 }
 0x1be   : > { %1342 = vmatmul.msk.f32.vlgmr.msra.gmra.mxu1 %vm727_vm2, %v476_v26 }
 0x1bf   : > { %1347 = vmatpush.xpose.msk.msrb.mxu1 %vm727_vm2, %v604_v21 }
 0x1c0   : > { %1344 = vmatmul.msk.f32.vlgmr.msra.gmra.mxu2 %vm727_vm2, %v478_v27 }
 0x1c6   : > { %1348 = vmatmul.msk.f32.vlgmr.msrb.gmra.mxu1 %vm727_vm2, %v482_v30 }
 0x23b   : > { %v751_v31 = vpop.f32.mrf.mxu1 }
 0x23c   : > { %v832_v32 = vmul.f32 0.35355338, %v751_v31 }
 0x23e   : > { %v836_v33 = vsel %vm727_vm2, %v832_v32, -inf }
 0x23f   : > { %v803_v34 = vpop.f32.mrf.mxu3  ;;  %837 = vmax.xlane.f32.xlu1 %v836_v33 }
 0x240   : > { %v834_v35 = vmul.f32 0.35355338, %v803_v34 }
 0x242   : > { %v842_v36 = vsel %vm727_vm2, %v834_v35, -inf }
 0x243   : > { %843 = vmax.xlane.f32.xlu0 %v842_v36  ;;  %v777_v37 = vpop.f32.mrf.mxu2  ;;  %v829_v40 = vpop.f32.mrf.mxu1 }
 0x244   : > { %v833_v38 = vmul.f32 0.35355338, %v777_v37  ;;  %v835_v41 = vmul.f32 0.35355338, %v829_v40 }
 0x246   : > { %v839_v39 = vsel %vm727_vm2, %v833_v38, -inf  ;;  %v845_v42 = vsel %vm727_vm2, %v835_v41, -inf }
 0x247   : > { %840 = vmax.xlane.f32.xlu2 %v839_v39 }
 0x24f   : > { %846 = vmax.xlane.f32.xlu2 %v845_v42 }
 0x258   : > { %1439 = vrot.lane.b32.xlu1 %v1438_v43, %s1644_s22 }
 0x267   : > { %1444 = vrot.lane.b32.xlu2 %v1443_v44, %s1644_s22  ;;  %s1236_s22 = sshll.u32 %s328_s8, 4  ;;  %s1237_s22 = int_to_ptr.vmem [resolvable:$true] %s1236_s22 }
 0x2b2   : > { %v838_v45 = vpop.xlane.xlu1 %837 }
 0x2b3   : > { %v848_v46 = vsub.f32 %v832_v32, %v838_v45 }
 0x2b5   : > { %v852_v47 = vmul.f32 1.442695, %v848_v46 }
 0x2b6   : > { %v844_v48 = vpop.xlane.xlu0 %843 }
 0x2b7   : > { %1452 = vpow2.f32 %v852_v47  ;;  %v850_v52 = vsub.f32 %v834_v35, %v844_v48 }
 0x2b9   : > { %v856_v8 = vmul.f32 1.442695, %v850_v52 }
 0x2ba   : > { %v841_v49 = vpop.xlane.xlu2 %840 }
 0x2bb   : > { %v849_v50 = vsub.f32 %v833_v38, %v841_v49 }
 0x2bd   : > { %v1933_v51 = vpop.eup %1452  ;;  %v854_v53 = vmul.f32 1.442695, %v849_v50 }
 0x2be   : > { %v860_v7 = vsel %vm727_vm2, %v1933_v51, 0.0 }
 0x2bf   : > { %1454 = vpow2.f32 %v854_v53  ;;  %861 = vadd.xlane.f32.xlu0 %v860_v7 }
 0x2c0   : > { %1456 = vpow2.f32 %v856_v8 }
 0x2c2   : > { %v847_v54 = vpop.xlane.xlu2 %846 }
 0x2c3   : > { %v851_v9 = vsub.f32 %v835_v41, %v847_v54 }
 0x2c5   : > { %v1937_v10 = vpop.eup %1454  ;;  %v858_v55 = vmul.f32 1.442695, %v851_v9 }
 0x2c6   : > { %v863_v56 = vsel %vm727_vm2, %v1937_v10, 0.0  ;;  %v1941_v59 = vpop.eup %1456 }
 0x2c7   : > { %1458 = vpow2.f32 %v858_v55  ;;  %864 = vadd.xlane.f32.xlu0 %v863_v56  ;;  %v866_v6 = vsel %vm727_vm2, %v1941_v59, 0.0 }
 0x2ca   : > { %v1440_v57 = vpop.permute.xlu1 %1439  ;;  %v1445_v58 = vpop.permute.xlu2 %1444 }
 0x2cb   : > { %v1442_v60 = vunpack.i.h.bf16 %v1440_v57  ;;  %v1441_v61 = vunpack.i.l.bf16 %v1440_v57  ;;  %v1447_v62 = vunpack.i.h.bf16 %v1445_v58  ;;  %v1446_v63 = vunpack.i.l.bf16 %v1445_v58 }
 0x2cd   : > { %v1943_v0 = vpop.eup %1458  ;;  %v631_v1 = vrot.slane %v1442_v60, 4  ;;  %v619_v2 = vrot.slane %v1441_v61, 4  ;;  %v629_v3 = vrot.slane %v1447_v62, 4  ;;  %v617_v5 = vrot.slane %v1446_v63, 4 }
 0x2ce   : > { %v869_v11 = vsel %vm727_vm2, %v1943_v0, 0.0 }
 0x2cf   : > { %v630_v12 = vsel %vm373_vm1, %v629_v3, %v1442_v60  ;;  %v632_v13 = vsel %vm373_vm1, %v1447_v62, %v631_v1  ;;  %v618_v14 = vsel %vm373_vm1, %v617_v5, %v1441_v61  ;;  %v620_v16 = vsel %vm373_vm1, %v1446_v63, %v619_v2  ;;  %867 = vadd.xlane.f32.xlu0 %v866_v6 }
 0x2d0   : > { %v636_v17 = vperm.slane %v630_v12, %v1827_v15  ;;  %v640_v18 = vperm.slane %v632_v13, %v1827_v15  ;;  %v624_v19 = vperm.slane %v618_v14, %v1827_v15  ;;  %v628_v20 = vperm.slane %v620_v16, %v1827_v15  ;;  %870 = vadd.xlane.f32.xlu1 %v869_v11 }
 0x2d2   : > { %v641_v21 = vrot.slane %v636_v17, 4  ;;  %v653_v22 = vrot.slane %v640_v18, 4  ;;  %v643_v23 = vrot.slane %v624_v19, 4  ;;  %v655_v24 = vrot.slane %v628_v20, 4 }
 0x2d4   : > { %v642_v25 = vsel %vm373_vm1, %v641_v21, %v624_v19  ;;  %v644_v26 = vsel %vm373_vm1, %v636_v17, %v643_v23  ;;  %v654_v27 = vsel %vm373_vm1, %v653_v22, %v628_v20  ;;  %v656_v28 = vsel %vm373_vm1, %v640_v18, %v655_v24 }
 0x2d5   : > { %v648_v30 = vperm.slane %v642_v25, %v1843_v29  ;;  %v652_v31 = vperm.slane %v644_v26, %v1843_v29  ;;  %v660_v32 = vperm.slane %v654_v27, %v1843_v29  ;;  %v664_v33 = vperm.slane %v656_v28, %v1843_v29 }
 0x2d7   : > { %v667_v34 = vrot.slane %v652_v31, 4  ;;  %v669_v35 = vrot.slane %v660_v32, 4  ;;  %v671_v36 = vrot.slane %v664_v33, 4  ;;  %v665_v37 = vrot.slane %v648_v30, 4 }
 0x2d9   : > { %v672_v38 = vsel %vm373_vm1, 0.0, %v671_v36  ;;  %v668_v39 = vsel %vm373_vm1, 0.0, %v667_v34  ;;  %v673_v41 = vsel %vm373_vm1, %v667_v34, %v648_v30  ;;  %v684_v43 = vsel %vm373_vm1, %v671_v36, %v660_v32 }
 0x2da   : > { %v689_v40 = vrot.slane %v672_v38, 4  ;;  %v678_v42 = vrot.slane %v668_v39, 4  ;;  %v666_v44 = vsel %vm373_vm1, 0.0, %v665_v37  ;;  %v670_v45 = vsel %vm373_vm1, 0.0, %v669_v35 }
 0x2db   : > { %v677_v46 = vperm.slane %v673_v41, %v1827_v15  ;;  %v688_v47 = vperm.slane %v684_v43, %v1827_v15 }
 0x2dc   : > { %v679_v48 = vsel %vm373_vm1, %v678_v42, %v666_v44  ;;  %v690_v49 = vsel %vm373_vm1, %v689_v40, %v670_v45 }
 0x2dd   : > { %v683_v50 = vperm.slane %v679_v48, %v1827_v15  ;;  %v694_v52 = vperm.slane %v690_v49, %v1827_v15  ;;  %v697_v53 = vrot.slane %v677_v46, 4  ;;  %v709_v7 = vrot.slane %v688_v47, 4 }
 0x2df   : > { %v698_v8 = vsel %vm373_vm1, %v683_v50, %v697_v53  ;;  %v710_v54 = vsel %vm373_vm1, %v694_v52, %v709_v7  ;;  %v695_v9 = vrot.slane %v683_v50, 4  ;;  %v707_v55 = vrot.slane %v694_v52, 4 }
 0x2e0   : > { %v706_v56 = vperm.slane %v698_v8, %v1843_v29  ;;  %v718_v57 = vperm.slane %v710_v54, %v1843_v29 }
 0x2e1   : > { %v696_v58 = vsel %vm373_vm1, %v695_v9, %v677_v46  ;;  %v708_v60 = vsel %vm373_vm1, %v707_v55, %v688_v47 }
 0x2e2   : > { %v723_v61 = vrot.slane %v718_v57, 4  ;;  %v725_v62 = vrot.slane %v706_v56, 4  ;;  %v702_v63 = vperm.slane %v696_v58, %v1843_v29  ;;  %v714_v1 = vperm.slane %v708_v60, %v1843_v29 }
 0x2e4   : > { %v724_v2 = vsel %vm373_vm1, %v723_v61, %v706_v56  ;;  %v726_v3 = vsel %vm373_vm1, %v718_v57, %v725_v62  ;;  %v719_v5 = vrot.slane %v714_v1, 4  ;;  %v721_v6 = vrot.slane %v702_v63, 4 }
 0x2e5   : > { %996 = vmatpush.msrb.mxu0 %v724_v2  ;;  %1019 = vmatpush.msra.mxu1 %v726_v3 }
 0x2e6   : > { %v720_v11 = vsel %vm373_vm1, %v719_v5, %v702_v63  ;;  %v722_v12 = vsel %vm373_vm1, %v714_v1, %v721_v6 }
 0x2e7   : > { %950 = vmatpush.msrb.mxu2 %v720_v11  ;;  %973 = vmatpush.msrb.mxu3 %v722_v12 }
 0x332   : > { %v862_v13 = vpop.xlane.xlu0 %861 }
 0x333   : > { %1460 = vrcp.f32 %v862_v13  ;;  %v883_v20 = vand.u32 2147483648, %v862_v13  ;;  %vm877_vm4 = vweird.f32 %v862_v13  ;;  %v881_v22 = vand.u32 2147483647, %v862_v13 }
 0x335   : > { %v884_v27 = vor.u32 1.1754944e-38, %v883_v20  ;;  %vm882_vm6 = vcmp.eq.f32.partialorder %v881_v22, 8.507059e+37 }
 0x339   : > { %v1461_v14 = vpop.eup %1460 }
 0x33a   : > { %v873_v16 = vmul.f32 %v1461_v14, %v862_v13  ;;  %v865_v17 = vpop.xlane.xlu0 %864  ;;  %vm878_vm3 = vweird.f32 %v1461_v14 }
 0x33b   : > { %1462 = vrcp.f32 %v865_v17  ;;  %vm879_vm5 = vmor %vm877_vm4, %vm878_vm3  ;;  %v898_v31 = vand.u32 2147483648, %v865_v17  ;;  %v896_v34 = vand.u32 2147483647, %v865_v17  ;;  %vm892_vm8 = vweird.f32 %v865_v17 }
 0x33c   : > { %v874_v18 = vsub.f32 1.0, %v873_v16 }
 0x33d   : > { %v899_v38 = vor.u32 1.1754944e-38, %v898_v31  ;;  %vm897_vm10 = vcmp.eq.f32.partialorder %v896_v34, 8.507059e+37 }
 0x33e   : > { %v875_v19 = vmul.f32 %v1461_v14, %v874_v18 }
 0x340   : > { %v876_v21 = vadd.f32 %v1461_v14, %v875_v19 }
 0x341   : > { %v1463_v23 = vpop.eup %1462 }
 0x342   : > { %v888_v24 = vmul.f32 %v1463_v23, %v865_v17  ;;  %v868_v25 = vpop.xlane.xlu0 %867  ;;  %v880_v26 = vsel %vm879_vm5, %v1461_v14, %v876_v21  ;;  %vm893_vm7 = vweird.f32 %v1463_v23 }
 0x343   : > { %1464 = vrcp.f32 %v868_v25  ;;  %v871_v28 = vpop.xlane.xlu1 %870  ;;  %v885_v32 = vsel %vm882_vm6, %v884_v27, %v880_v26  ;;  %vm894_vm9 = vmor %vm892_vm8, %vm893_vm7  ;;  %v913_v46 = vand.u32 2147483648, %v868_v25  ;;  %vm907_vm13 = vweird.f32 %v868_v25 }
 0x344   : > { %v889_v30 = vsub.f32 1.0, %v888_v24  ;;  %1466 = vrcp.f32 %v871_v28  ;;  %v886_v35 = vmul.f32 %v1933_v51, %v885_v32  ;;  %v911_v51 = vand.u32 2147483647, %v868_v25 }
 0x345   : > { %v928_v49 = vand.u32 2147483648, %v871_v28  ;;  %v926_v52 = vand.u32 2147483647, %v871_v28  ;;  %v914_v7 = vor.u32 1.1754944e-38, %v913_v46  ;;  %vm922_vm15 = vweird.f32 %v871_v28 }
 0x346   : > { %v890_v33 = vmul.f32 %v1463_v23, %v889_v30  ;;  %1349 = vmatmul.msk.f32.vlgmr.msrb.gmra.mxu2 %vm727_vm2, %v886_v35  ;;  %vm912_vm3 = vcmp.eq.f32.partialorder %v911_v51, 8.507059e+37  ;;  %vm1147_vm6 = vcmask 130048   ;;  %vm1149_vm7 = vcmask 195584  }
 0x347   : > { %vm927_vm5 = vcmp.eq.f32.partialorder %v926_v52, 8.507059e+37 }
 0x348   : > { %v891_v36 = vadd.f32 %v1463_v23, %v890_v33 }
 0x349   : > { %v1465_v37 = vpop.eup %1464 }
 0x34a   : > { %v1467_v39 = vpop.eup %1466  ;;  %v903_v40 = vmul.f32 %v1465_v37, %v868_v25  ;;  %v895_v41 = vsel %vm894_vm9, %v1463_v23, %v891_v36  ;;  %vm908_vm11 = vweird.f32 %v1465_v37 }
 0x34b   : > { %v918_v42 = vmul.f32 %v1467_v39, %v871_v28  ;;  %v900_v43 = vsel %vm897_vm10, %v899_v38, %v895_v41  ;;  %vm923_vm12 = vweird.f32 %v1467_v39  ;;  %vm909_vm14 = vmor %vm907_vm13, %vm908_vm11 }
 0x34c   : > { %v904_v44 = vsub.f32 1.0, %v903_v40  ;;  %v901_v45 = vmul.f32 %v1937_v10, %v900_v43  ;;  %vm924_vm4 = vmor %vm922_vm15, %vm923_vm12  ;;  %v929_v10 = vor.u32 1.1754944e-38, %v928_v49 }
 0x34d   : > { %v919_v47 = vsub.f32 1.0, %v918_v42 }
 0x34e   : > { %v905_v48 = vmul.f32 %v1465_v37, %v904_v44  ;;  %1350 = vmatmul.msk.f32.vlgmr.msrb.gmra.mxu3 %vm727_vm2, %v901_v45 }
 0x34f   : > { %v920_v50 = vmul.f32 %v1467_v39, %v919_v47 }
 0x350   : > { %v906_v53 = vadd.f32 %v1465_v37, %v905_v48 }
 0x351   : > { %v921_v8 = vadd.f32 %v1467_v39, %v920_v50 }
 0x352   : > { %v910_v54 = vsel %vm909_vm14, %v1465_v37, %v906_v53 }
 0x353   : > { %v925_v9 = vsel %vm924_vm4, %v1467_v39, %v921_v8  ;;  %v915_v55 = vsel %vm912_vm3, %v914_v7, %v910_v54 }
 0x354   : > { %v930_v56 = vsel %vm927_vm5, %v929_v10, %v925_v9  ;;  %v916_v57 = vmul.f32 %v1941_v59, %v915_v55 }
 0x355   : > { %v931_v58 = vmul.f32 %v1943_v0, %v930_v56 }
 0x356   : > { %1351 = vmatmul.msk.f32.vlgmr.msrb.gmra.mxu0 %vm727_vm2, %v916_v57 }
 0x357   : > { %1352 = vmatmul.msk.f32.vlgmr.msra.gmra.mxu1 %vm727_vm2, %v931_v58 }
 0x3c9   : > { %v952_v60 = vpop.f32.mrf.mxu2 }
 0x3ca   : > { %v1026_v62 = vrot.slane %v952_v60, 4 }
 0x3d1   : > { %v975_v61 = vpop.f32.mrf.mxu3 }
 0x3d2   : > { %v1038_v63 = vrot.slane %v975_v61, 4 }
 0x3d3   : > { %v998_v1 = vpop.f32.mrf.mxu0 }
 0x3d4   : > { %v1024_v2 = vrot.slane %v998_v1, 4  ;;  %v1027_v3 = vsel %vm373_vm1, %v998_v1, %v1026_v62  ;;  %v1021_v5 = vpop.f32.mrf.mxu1  ;;  %v1154_v1 = vld [vmem:[#allocation7 + $0x18] sm:$0xff] }
 0x3d5   : > { %v1035_v6 = vperm.slane %v1027_v3, %v1827_v15  ;;  %v1036_v11 = vrot.slane %v1021_v5, 4  ;;  %v1039_v59 = vsel %vm373_vm1, %v1021_v5, %v1038_v63  ;;  %1174 = vmatpush.msra.mxu2 %v1154_v1  ;;  %v1152_v3 = vld [vmem:[#allocation7 + $0x8] sm:$0xff] }
 0x3d6   : > { %v1025_v0 = vsel %vm373_vm1, %v1024_v2, %v952_v60  ;;  %v1047_v12 = vperm.slane %v1039_v59, %v1827_v15  ;;  %v1153_v2 = vld [vmem:[#allocation7 + $0x10] sm:$0xff] }
 0x3d7   : > { %v1031_v13 = vperm.slane %v1025_v0, %v1827_v15  ;;  %v1062_v14 = vrot.slane %v1035_v6, 4  ;;  %v1037_v16 = vsel %vm373_vm1, %v1036_v11, %v975_v61  ;;  %1175 = vmatpush.msra.mxu2 %v1153_v2 }
 0x3d8   : > { %v1043_v17 = vperm.slane %v1037_v16, %v1827_v15  ;;  %v1060_v18 = vrot.slane %v1047_v12, 4 }
 0x3d9   : > { %v1050_v19 = vrot.slane %v1031_v13, 4  ;;  %v1063_v20 = vsel %vm373_vm1, %v1047_v12, %v1062_v14  ;;  %1176 = vmatpush.msra.mxu2 %v1152_v3 }
 0x3da   : > { %v1048_v21 = vrot.slane %v1043_v17, 4  ;;  %v1061_v22 = vsel %vm373_vm1, %v1060_v18, %v1035_v6  ;;  %v1071_v23 = vperm.slane %v1063_v20, %v1843_v29 }
 0x3db   : > { %v1051_v24 = vsel %vm373_vm1, %v1043_v17, %v1050_v19  ;;  %v1067_v25 = vperm.slane %v1061_v22, %v1843_v29  ;;  %v1648_v19 = vmov 32.0  }
 0x3dc   : > { %v1049_v26 = vsel %vm373_vm1, %v1048_v21, %v1031_v13  ;;  %v1059_v27 = vperm.slane %v1051_v24, %v1843_v29  ;;  %v1078_v28 = vrot.slane %v1071_v23, 4  ;;  %v1449_v13 = vld [vmem:[%s2091_s4] ss:$0 sm:$0xff]  ;;  %1468 = vrcp.f32 %v1648_v19 }
 0x3dd   : > { %v1055_v30 = vperm.slane %v1049_v26, %v1843_v29  ;;  %v1076_v31 = vrot.slane %v1067_v25, 4 }
 0x3de   : > { %v1074_v32 = vrot.slane %v1059_v27, 4  ;;  %v1079_v33 = vsel %vm373_vm1, 0.0, %v1078_v28  ;;  %v1091_v34 = vsel %vm373_vm1, %v1078_v28, %v1067_v25 }
 0x3df   : > { %v1072_v35 = vrot.slane %v1055_v30, 4  ;;  %v1095_v36 = vperm.slane %v1091_v34, %v1827_v15  ;;  %v1096_v37 = vrot.slane %v1079_v33, 4  ;;  %v1077_v39 = vsel %vm373_vm1, 0.0, %v1076_v31 }
 0x3e0   : > { %v1075_v38 = vsel %vm373_vm1, 0.0, %v1074_v32  ;;  %v1080_v40 = vsel %vm373_vm1, %v1074_v32, %v1055_v30 }
 0x3e1   : > { %v1085_v41 = vrot.slane %v1075_v38, 4  ;;  %v1084_v42 = vperm.slane %v1080_v40, %v1827_v15  ;;  %v1097_v43 = vsel %vm373_vm1, %v1096_v37, %v1077_v39  ;;  %v1073_v44 = vsel %vm373_vm1, 0.0, %v1072_v35  ;;  %v1450_v40 = vld [vmem:[%s2092_s5] ss:$0 sm:$0xff] }
 0x3e2   : > { %v1101_v45 = vperm.slane %v1097_v43, %v1827_v15  ;;  %v1116_v46 = vrot.slane %v1095_v36, 4  ;;  %v1469_v20 = vpop.eup %1468  ;;  %v1451_v43 = vld [vmem:[%s2093_s6] ss:$0 sm:$0xff] }
 0x3e3   : > { %v1086_v47 = vsel %vm373_vm1, %v1085_v41, %v1073_v44  ;;  %v1104_v48 = vrot.slane %v1084_v42, 4  ;;  %v1189_v21 = vmul.f32 32.0, %v1469_v20 }
 0x3e4   : > { %v1090_v51 = vperm.slane %v1086_v47, %v1827_v15  ;;  %v1117_v49 = vsel %vm373_vm1, %v1101_v45, %v1116_v46  ;;  %v1114_v50 = vrot.slane %v1101_v45, 4 }
 0x3e5   : > { %v1125_v52 = vperm.slane %v1117_v49, %v1843_v29  ;;  %v1190_v22 = vsub.f32 1.0, %v1189_v21 }
 0x3e6   : > { %v1105_v53 = vsel %vm373_vm1, %v1090_v51, %v1104_v48  ;;  %v1102_v7 = vrot.slane %v1090_v51, 4  ;;  %v1115_v8 = vsel %vm373_vm1, %v1114_v50, %v1095_v36 }
 0x3e7   : > { %v1113_v10 = vperm.slane %v1105_v53, %v1843_v29  ;;  %v1130_v54 = vrot.slane %v1125_v52, 4  ;;  %v1121_v9 = vperm.slane %v1115_v8, %v1843_v29  ;;  %v1191_v23 = vmul.f32 %v1469_v20, %v1190_v22 }
 0x3e8   : > { %v1103_v55 = vsel %vm373_vm1, %v1102_v7, %v1084_v42 }
 0x3e9   : > { %v1131_v56 = vsel %vm373_vm1, %v1130_v54, %v1113_v10  ;;  %v1109_v15 = vperm.slane %v1103_v55, %v1843_v29  ;;  %v1126_v57 = vrot.slane %v1121_v9, 4  ;;  %v1132_v62 = vrot.slane %v1113_v10, 4  ;;  %v1151_v29 = vld [vmem:[#allocation7] sm:$0xff] }
 0x3ea   : > { %1139 = vrot.lane.b32.xlu0 %v1131_v56, %s1645_s12  ;;  %1177 = vmatpush.msra.mxu2 %v1151_v29  ;;  %v1192_v24 = vadd.f32 %v1469_v20, %v1191_v23  ;;  %s1238_s12 = sshll.u32 %s1234_s18, 4  ;;  %s1239_s12 = int_to_ptr.hbm [resolvable:$true] %s1238_s12 }
 0x3eb   : > { %v1128_v58 = vrot.slane %v1109_v15, 4  ;;  %v1127_v60 = vsel %vm373_vm1, %v1126_v57, %v1109_v15  ;;  %v1133_v63 = vsel %vm373_vm1, %v1125_v52, %v1132_v62 }
 0x3ed   : > { %v1129_v61 = vsel %vm373_vm1, %v1121_v9, %v1128_v58  ;;  %vm1193_vm1 = vweird.f32 %v1469_v20 }
 0x3ee   : > { %1135 = vrot.lane.b32.xlu2 %v1129_v61, %s1646_s13  ;;  %v1194_v25 = vsel %vm1193_vm1, %v1469_v20, %v1192_v24  ;;  %s1224_s13 = scalar_lea.sflag [#allocation4], %s1789_s30 }
 0x3f6   : > { %1143 = vrot.lane.b32.xlu2 %v1133_v63, %s1647_s14  ;;  %s1576_s14 = sshra.s32 %s1239_s12, 4  ;;  %s1577_s14 = int_to_ptr.hbm [resolvable:$true] %s1576_s14 }
 0x3f7   : > { %s1578_s15 = scalar_lea.hbm %s1577_s14, 8  ;;  %p1583_p12 = scmp.lt.s32.totalorder %s1577_s14, %s2094_s7 }
 0x3f8   : > { %p1579_p1 = scmp.ne.s32.totalorder %s1577_s14, %s1578_s15  ;;  %p1584_p7 = scmp.lt.s32.totalorder %s1582_s16, %s1578_s15 }
 0x3fa   : > { %p1580_p3 = pnand %p1579_p1, %p1758_p4  ;;  %p1585_p8 = por %p1584_p7, %p1583_p12 }
 0x3fc   : > { %p1581_p5 = pneg %p1580_p3 }
 0x3fe   : > { %p1586_p9 = pnand %p1585_p8, %p1581_p5 }
 0x448   : > { %v1136_v5 = vpop.permute.xlu2 %1135 }
 0x449   : > { %v1146_v6 = vsel %vm727_vm2, %v1127_v60, %v1136_v5 }
 0x450   : > { %v1144_v59 = vpop.permute.xlu2 %1143 }
 0x45c   : > { %v1140_v11 = vpop.permute.xlu0 %1139 }
 0x45d   : > { %v1148_v0 = vsel %vm1147_vm6, %v1146_v6, %v1140_v11 }
 0x45e   : > { %v1150_v12 = vsel %vm1149_vm7, %v1148_v0, %v1144_v59 }
 0x45f   : > { %1353 = vmatmul.msk.f32.vlgmr.msra.gmra.mxu2 %vm338_vm0, %v1150_v12 }
 0x4e2   : > { %v1179_v14 = vpop.f32.mrf.mxu2 }
 0x4e3   : > { %v1180_v16 = vadd.f32 %v1449_v13, %v1179_v14 }
 0x4e5   : > { %v1182_v17 = vadd.f32 %v1180_v16, %v1803_v4 }
 0x4e7   : > { %v1185_v18 = vsel %vm338_vm0, %v1182_v17, 0.0 }
 0x4e8   : > { %1186 = vadd.xlane.f32.xlu2 %v1185_v18 }
 0x55b   : > { %v1187_v26 = vpop.xlane.xlu2 %1186 }
 0x55c   : > { %v1195_v27 = vmul.f32 %v1194_v25, %v1187_v26 }
 0x55e   : > { %v1196_v28 = vsub.f32 %v1182_v17, %v1195_v27 }
 0x560   : > { %v1197_v30 = vmul.f32 %v1196_v28, %v1196_v28 }
 0x562   : > { %v1198_v31 = vsel %vm338_vm0, %v1197_v30, 0.0 }
 0x563   : > { %1199 = vadd.xlane.f32.xlu0 %v1198_v31 }
 0x5d6   : > { %v1200_v4 = vpop.xlane.xlu0 %1199 }
 0x5d7   : > { %v1201_v32 = vmul.f32 %v1200_v4, %v1194_v25 }
 0x5d9   : > { %v1202_v33 = vadd.f32 1e-12, %v1201_v32 }
 0x5db   : > { %1470 = vrsqrt.f32 %v1202_v33  ;;  %vm1209_vm8 = vweird.f32 %v1202_v33 }
 0x5e1   : > { %v1471_v34 = vpop.eup %1470 }
 0x5e2   : > { %v1204_v35 = vmul.f32 %v1471_v34, %v1202_v33  ;;  %vm1210_vm2 = vweird.f32 %v1471_v34 }
 0x5e3   : > { %vm1211_vm9 = vmor %vm1209_vm8, %vm1210_vm2 }
 0x5e4   : > { %v1205_v36 = vmul.f32 %v1471_v34, %v1204_v35 }
 0x5e6   : > { %v1206_v37 = vmul.f32 0.5, %v1205_v36 }
 0x5e8   : > { %v1207_v38 = vsub.f32 1.5, %v1206_v37 }
 0x5ea   : > { %v1208_v39 = vmul.f32 %v1471_v34, %v1207_v38 }
 0x5ec   : > { %v1212_v41 = vsel %vm1211_vm9, %v1471_v34, %v1208_v39 }
 0x5ed   : > { %v1213_v42 = vmul.f32 %v1212_v41, %v1196_v28 }
 0x5ef   : > { %v1217_v44 = vmul.f32 %v1450_v40, %v1213_v42 }
 0x5f1   : > { %v1221_v45 = vadd.f32 %v1451_v43, %v1217_v44 }
 0x5f3   : > { %1222 = vst.msk [vmem:[%s328_s8] sm:$0xff] %vm338_vm0, %v1221_v45 }
 0x5f4   : > { %1589 = shalt.err (!%p1586_p9)
}
 0x5f5   : > { %1368 = dma.vmem_to_hbm [thread:$0]  (%p1758_p4), %s1237_s22, 128, %s1239_s12, %s1224_s13  }
 0x5f6 PF: > { %s1250_s30 = sand.u32 1, %s1620_s24   ;;  %p2105_p10 = scmp.ge.s32.totalorder %s1632_s27, 2 }
 0x5f7   : > { %s1251_s9 = scalar_lea.sflag [#allocation4], %s1250_s30 }
 0x5f8   : > { %p1382_p13 = pnand %p2105_p10, %p1762_p6 }
 0x5fa   : > { %p1383_p11 = pneg %p1382_p13 }
 0x5fc   : > { %1615 = dma.done.wait (%p1383_p11), %s1251_s9, 128  }
 0x5fd   : > { %1617 = vsyncadd (%p1383_p11), %s1251_s9, 4294967168  ;;  %p21_p0 = scmp.ge.s32.totalorder %s1732_s20, 4   ;;  %s2106_s24 = smov %s1624_s25 }
 0x5fe   : > { %s2107_s25 = smov %s1628_s26  ;;  %s2108_s26 = smov %s1743_s23 }
 0x5ff   : > { %s2109_s27 = smov %s1732_s20  ;;  %23 = sbr.rel (!%p21_p0) target bundleno = 9 (0x9), region = 101 }
 0x604   :  { %1257 = vsyncpa [#allocation3], 1 }
 0x605   :  { %1259 = vsyncpa [#allocation3 + $0x1], 1 }
 0x606   :  { %1260 = vsyncpa [#allocation6], 1 }
 0x607   :  { %1261 = vsyncpa [#allocation4], 1 }
 0x608   :  { %1263 = vsyncpa [#allocation4 + $0x1], 1 }

</bundles_post_ra>
